<compile_context>
chip_gen: v5e
topology: v5e:2x2
jax: 0.10.0
libtpu: 0.0.40
codegen_flags: <defaults>
</compile_context>

<pallas_src>
import jax
import jax.numpy as jnp
from jax.experimental import pallas as pl
from jax.experimental.pallas import tpu as pltpu

_LANE = 128
_SUBLANE = 8
_TARGET_BLOCK_BYTES = 1 << 20  # ~1 MiB per input block (4 MiB double-buffered)


def _augment_kernel(scale_ref, bias_ref, x_ref, o_ref):
    # scale_ref / bias_ref: (row_block, 1) VMEM columns (one scalar per
    # (image, channel) row); broadcast over the lane axis.
    # x_ref / o_ref: (row_block, hw_tile) lane-dense VMEM tiles.
    o_ref[...] = x_ref[...] * scale_ref[...] + bias_ref[...]


def _choose_tiling(R, HW, itemsize=4):
    """Pick (row_block, hw_tile) for the (R, HW) view, targeting ~1 MiB blocks."""
    row_bytes = HW * itemsize
    rows_in_budget = _TARGET_BLOCK_BYTES // max(row_bytes, 1)

    if rows_in_budget >= R:
        # Whole tensor fits one ~1 MiB block.  If there are enough rows,
        # still split them into two 8-aligned blocks so a v7x chip can feed
        # both TensorCores.
        if R >= 2 * _SUBLANE:
            row_block = pl.cdiv(pl.cdiv(R, 2), _SUBLANE) * _SUBLANE
        else:
            row_block = R            # full extent (always legal)
        return row_block, HW

    if rows_in_budget >= _SUBLANE:
        # Full spatial extent per block; fold as many (image, channel) rows
        # as fit while keeping the sublane dim 8-aligned.
        return (rows_in_budget // _SUBLANE) * _SUBLANE, HW

    # Single rows are large (big images): take one sublane group of rows and
    # tile the spatial axis in lane (128) multiples.
    row_block = min(R, _SUBLANE)
    hw_tile = max(_LANE,
                  (_TARGET_BLOCK_BYTES // (row_block * itemsize)) // _LANE * _LANE)
    if hw_tile >= HW:
        hw_tile = HW                 # full extent — avoids oversized blocks
    return row_block, hw_tile


def base_imager_augmenter_forward(batch, mean, std):
    """batch: (N, C, H, W) float32. Returns (N, C, H, W) float32.

    Computes (batch - mean[c]) / std[c] per channel (std == 0 is unguarded,
    matching the plain-JAX / torchvision reference behavior).
    """
    N, C, H, W = batch.shape
    HW = H * W
    R = N * C

    # Free, contiguous reshape: (N, C, H, W) -> (N*C, H*W).
    x = batch.reshape(R, HW).astype(jnp.float32)

    # y = x * (1/std[c]) + (-mean[c]/std[c])  ==  (x - mean[c]) / std[c]
    scale = jnp.tile((1.0 / std).astype(jnp.float32).reshape(C), (N,)).reshape(R, 1)
    bias = jnp.tile((-mean / std).astype(jnp.float32).reshape(C), (N,)).reshape(R, 1)

    row_block, hw_tile = _choose_tiling(R, HW)
    grid = (pl.cdiv(R, row_block), pl.cdiv(HW, hw_tile))

    out = pl.pallas_call(
        _augment_kernel,
        out_shape=jax.ShapeDtypeStruct((R, HW), jnp.float32),
        grid_spec=pltpu.PrefetchScalarGridSpec(
            num_scalar_prefetch=0,
            grid=grid,
            in_specs=[
                # Tiny per-row param columns; re-fetched only when the row
                # block index changes.
                pl.BlockSpec((row_block, 1), lambda r, h: (r, 0)),
                pl.BlockSpec((row_block, 1), lambda r, h: (r, 0)),
                pl.BlockSpec((row_block, hw_tile), lambda r, h: (r, h)),
            ],
            out_specs=pl.BlockSpec((row_block, hw_tile), lambda r, h: (r, h)),
        ),
        compiler_params=pltpu.CompilerParams(
            # All grid axes are independent -> shard across both v7x TCs.
            dimension_semantics=("parallel", "parallel"),
        ),
    )(scale, bias, x)

    return out.reshape(N, C, H, W)


if __name__ == "__main__":
    key = jax.random.PRNGKey(0)

    # Primary check: H*W is a multiple of 128.
    N, C, H, W = 2, 4, 16, 16
    batch = jax.random.uniform(key, (N, C, H, W), dtype=jnp.float32)
    mean = jnp.linspace(0.4, 0.5, C, dtype=jnp.float32)
    std = jnp.linspace(0.2, 0.3, C, dtype=jnp.float32)

    out = base_imager_augmenter_forward(batch, mean, std)
    out = jax.block_until_ready(out)

    ref = (batch - mean.reshape(1, C, 1, 1)) / std.reshape(1, C, 1, 1)
    assert out.shape == (N, C, H, W)
    assert jnp.allclose(out, ref, atol=1e-5, rtol=1e-5)

    # Secondary check: H*W NOT a multiple of 128 (no wrapper pad/slice now).
    N2, C2, H2, W2 = 2, 3, 15, 15
    batch2 = jax.random.uniform(jax.random.PRNGKey(0), (N2, C2, H2, W2),
                                dtype=jnp.float32)
    mean2 = jnp.linspace(0.3, 0.6, C2, dtype=jnp.float32)
    std2 = jnp.linspace(0.15, 0.35, C2, dtype=jnp.float32)

    out2 = base_imager_augmenter_forward(batch2, mean2, std2)
    out2 = jax.block_until_ready(out2)

    ref2 = (batch2 - mean2.reshape(1, C2, 1, 1)) / std2.reshape(1, C2, 1, 1)
    assert out2.shape == (N2, C2, H2, W2)
    assert jnp.allclose(out2, ref2, atol=1e-5, rtol=1e-5)

    # Tertiary check: enough rows to exercise the multi-block row path
    # (ragged last row block) with a lane-dense spatial extent.
    N3, C3, H3, W3 = 6, 3, 48, 48
    batch3 = jax.random.uniform(jax.random.PRNGKey(0), (N3, C3, H3, W3),
                                dtype=jnp.float32)
    mean3 = jnp.linspace(0.35, 0.55, C3, dtype=jnp.float32)
    std3 = jnp.linspace(0.2, 0.3, C3, dtype=jnp.float32)

    out3 = base_imager_augmenter_forward(batch3, mean3, std3)
    out3 = jax.block_until_ready(out3)

    ref3 = (batch3 - mean3.reshape(1, C3, 1, 1)) / std3.reshape(1, C3, 1, 1)
    assert out3.shape == (N3, C3, H3, W3)
    assert jnp.allclose(out3, ref3, atol=1e-5, rtol=1e-5)

    print("KERNEL_OK")
</pallas_src>

<mosaic_0001>
module attributes {stable_mosaic.version = 11 : i64} {
  func.func @_augment_kernel(%arg0: i32, %arg1: i32, %arg2: memref<8x1xf32, #tpu.memory_space<vmem>>, %arg3: memref<8x1xf32, #tpu.memory_space<vmem>>, %arg4: memref<8x256xf32, #tpu.memory_space<vmem>>, %arg5: memref<8x256xf32, #tpu.memory_space<vmem>>) attributes {dimension_semantics = [#tpu.dimension_semantics<parallel>, #tpu.dimension_semantics<parallel>], iteration_bounds = array<i64: 1, 1>, scalar_prefetch = 0 : i64, scratch_operands = 0 : i64, tpu.core_type = #tpu.core_type<tc>, window_params = [{transform_indices = @transform_0, window_bounds = array<i64: 8, 1>}, {transform_indices = @transform_1, window_bounds = array<i64: 8, 1>}, {transform_indices = @transform_2, window_bounds = array<i64: 8, 256>}, {transform_indices = @transform_3, window_bounds = array<i64: 8, 256>}]} {
    %c0 = arith.constant 0 : index
    %c0_0 = arith.constant 0 : index
    %0 = vector.load %arg4[%c0, %c0_0] : memref<8x256xf32, #tpu.memory_space<vmem>>, vector<8x256xf32>
    %c0_1 = arith.constant 0 : index
    %c0_2 = arith.constant 0 : index
    %1 = vector.load %arg2[%c0_1, %c0_2] : memref<8x1xf32, #tpu.memory_space<vmem>>, vector<8x1xf32>
    %2 = vector.broadcast %1 : vector<8x1xf32> to vector<8x256xf32>
    %3 = arith.mulf %0, %2 : vector<8x256xf32>
    %c0_3 = arith.constant 0 : index
    %c0_4 = arith.constant 0 : index
    %4 = vector.load %arg3[%c0_3, %c0_4] : memref<8x1xf32, #tpu.memory_space<vmem>>, vector<8x1xf32>
    %5 = vector.broadcast %4 : vector<8x1xf32> to vector<8x256xf32>
    %6 = arith.addf %3, %5 : vector<8x256xf32>
    %c0_5 = arith.constant 0 : index
    %c0_6 = arith.constant 0 : index
    %7 = vector.load %arg5[%c0_5, %c0_6] : memref<8x256xf32, #tpu.memory_space<vmem>>, vector<8x256xf32>
    tpu.vector_store %arg5[%c0_5, %c0_6], %6 {strides = array<i32>} : memref<8x256xf32, #tpu.memory_space<vmem>>, vector<8x256xf32>,
    return
  }
  func.func @transform_0(%arg0: i32, %arg1: i32) -> (i32, i32) {
    %c0_i32 = arith.constant 0 : i32
    %c0_i32_0 = arith.constant 0 : i32
    return %arg0, %c0_i32 : i32, i32
  }
  func.func @transform_1(%arg0: i32, %arg1: i32) -> (i32, i32) {
    %c0_i32 = arith.constant 0 : i32
    %c0_i32_0 = arith.constant 0 : i32
    return %arg0, %c0_i32 : i32, i32
  }
  func.func @transform_2(%arg0: i32, %arg1: i32) -> (i32, i32) {
    %c0_i32 = arith.constant 0 : i32
    return %arg0, %arg1 : i32, i32
  }
  func.func @transform_3(%arg0: i32, %arg1: i32) -> (i32, i32) {
    %c0_i32 = arith.constant 0 : i32
    return %arg0, %arg1 : i32, i32
  }
}

</mosaic_0001>

<bundles_post_ra>
// kernel: tpu_custom_call.1
= control target key start
LH: loop header
LB: loop body
LE: loop exit
PB: predicated region body
PF: predicated region fallthrough
CT: control target
= control target key end

     0   :  { %s117_s0 = inlined_call_operand.vmem [shape: f32[8,1], index: 0, kind: input, shape index: {}]   ;;  %s118_s1 = inlined_call_operand.vmem [shape: f32[8,1], index: 1, kind: input, shape index: {}]   ;;  %s119_s2 = inlined_call_operand.vmem [shape: f32[8,256], index: 2, kind: input, shape index: {}]   ;;  %s120_s3 = inlined_call_operand.hbm [shape: f32[8,256], index: 3, kind: output, shape index: {}]  }
   0x1   :  { %v17_v0 = vld [vmem:[%s117_s0] sm:$0xff] }
   0x2   :  { %8 = vsyncpa [#allocation3], 0  ;;  %v80_v1 = vmov 0   ;;  %v25_v2 = vld [vmem:[%s118_s1] sm:$0xff]  ;;  %v16_v5 = vld [vmem:[%s119_s2 + $0x8] sm:$0xff]  ;;  %s81_s0 = smov [#allocation2]  }
   0x3   :  { %53 = vset.pattern.permute.xlu0 %v80_v1  ;;  %v15_v4 = vld [vmem:[%s119_s2] sm:$0xff]  ;;  %s40_s20 = sshll.u32 %s81_s0, 4  ;;  %s42_s23 = sshll.u32 %s120_s3, 4  ;;  %s41_s20 = int_to_ptr.vmem [resolvable:$true] %s40_s20  ;;  %s43_s23 = int_to_ptr.hbm [resolvable:$true] %s42_s23 }
   0x4   :  { %20 = vperm.xlu0 %53, %v17_v0  }
   0xc   :  { %28 = vperm.xlu0 %53, %v25_v2  }
  0x76   :  { %v21_v3 = vpop.permute.xlu0 %20 }
  0x77   :  { %v23_v6 = vmul.f32 %v21_v3, %v15_v4  ;;  %v24_v7 = vmul.f32 %v21_v3, %v16_v5 }
  0x7e   :  { %v29_v8 = vpop.permute.xlu0 %28 }
  0x7f   :  { %v31_v9 = vadd.f32 %v29_v8, %v23_v6  ;;  %v32_v10 = vadd.f32 %v29_v8, %v24_v7 }
  0x81   :  { %33 = vst [vmem:[#allocation2] sm:$0xff] %v31_v9 }
  0x82   :  { %34 = vst [vmem:[#allocation2 + $0x8] sm:$0xff] %v32_v10 }
  0x83   :  { %45 = dma.vmem_to_hbm [thread:$0]  %s41_s20, 256, %s43_s23, [#allocation3]  }
  0x84   :  { %78 = dma.done.wait [#allocation3], 256  }
  0x85   :  { %79 = vsyncadd [#allocation3], 4294967040 }
  0x86   :  { %50 = vsyncpa [#allocation3], 1 }

</bundles_post_ra>
